<compile_context>
chip_gen: v6e
topology: v6e:2x2x1
jax: 0.10.0
libtpu: 0.0.40
codegen_flags: <defaults>
</compile_context>

<pallas_src>
import jax
import jax.numpy as jnp
from jax.experimental import pallas as pl
from jax.experimental.pallas import tpu as pltpu

GAMMA = 2.0
ALPHA = 0.8

LANES = 128


def _round_up(x, m):
    return ((x + m - 1) // m) * m


def _chip_config():
    """Returns (num_cores_split, max_tile_r, vmem_limit_bytes) for the local chip."""
    kind = ""
    try:
        kind = jax.devices()[0].device_kind.lower()
    except Exception:
        pass
    if "v7" in kind:
        # 2 TCs/chip; only 64 MiB physical VMEM per TC -> cap input buffers ~16 MiB.
        return 2, 8192, 40 * 1024 * 1024
    if "v5" in kind:
        # 1 TC; default scoped VMEM is only 16 MiB -> smaller tiles + explicit limit.
        return 1, 4096, 32 * 1024 * 1024
    # v6e / unknown: 1 TC, 128 MiB physical VMEM.
    return 1, 8192, 64 * 1024 * 1024


def _make_bce_kernel(num_blocks, bpc, tile_r, rem_rows, acc_split):
    """Per-tile clamped-BCE partial-sum kernel; all sizes baked in statically.

    Accumulates  y*log(p) + (1-y)*log(1-p)  (log terms clamped at -100); the
    final negate / mean / focal transform happen in the JAX glue.
    """

    def kernel(p_ref, y_ref, out_ref, acc_ref):
        j = pl.program_id(1)

        @pl.when(j == 0)
        def _():
            acc_ref[...] = jnp.zeros_like(acc_ref)

        p = p_ref[...].astype(jnp.float32)
        y = y_ref[...].astype(jnp.float32)
        # PyTorch binary_cross_entropy clamps the log terms at -100.  Clamp BEFORE
        # multiplying by y (otherwise 0 * -inf = NaN).
        log_p = jnp.maximum(jnp.log(p), -100.0)
        log_1mp = jnp.maximum(jnp.log(1.0 - p), -100.0)
        # == y*log_p + (1-y)*log_1mp, with one fewer mul/sub per element.
        val = log_1mp + y * (log_p - log_1mp)

        if rem_rows:
            # Only emitted when the row count is ragged; masks the garbage rows of
            # the (single) partial last block.  Must be a select, not a multiply
            # (garbage rows may hold NaN/Inf).
            blk = pl.program_id(0) * bpc + j
            valid_rows = jnp.where(blk == num_blocks - 1, rem_rows, tile_r)
            row_ids = jax.lax.broadcasted_iota(jnp.int32, val.shape, 0)
            val = jnp.where(row_ids < valid_rows, val, 0.0)

        # Per-lane/sublane partial sums: pure VPU adds, split into `acc_split`
        # independent accumulator vregs to break the serial add chain; the single
        # cross-lane reduce happens once, outside the kernel.
        v = val.reshape(-1, acc_split * 8, LANES).sum(axis=0)   # acc_split indep chains
        partial = v.reshape(acc_split, 8, LANES).sum(axis=0)     # short combine
        acc_ref[...] += partial

        @pl.when(j == pl.num_programs(1) - 1)
        def _():
            out_ref[...] = acc_ref[...].reshape(1, 8, LANES)

    return kernel


def focal_loss(predicted, label, gamma=GAMMA, alpha=ALPHA):
    p = predicted.reshape(-1)
    y = label.reshape(-1)
    n = p.shape[0]

    num_cores, max_tile_r, vmem_limit = _chip_config()

    n_aligned = (n // LANES) * LANES
    total = jnp.float32(0.0)

    if n_aligned:
        r_total = n_aligned // LANES
        p2 = p[:n_aligned].reshape(r_total, LANES)
        y2 = y[:n_aligned].reshape(r_total, LANES)

        tile_r = min(max_tile_r, _round_up(r_total, 8))
        num_blocks = -(-r_total // tile_r)

        if num_cores > 1:
            # Balance blocks evenly across the two v7x TensorCores; if that's not
            # feasible (tiny inputs), just use one core -- no overhang path needed.
            nb = _round_up(num_blocks, num_cores)
            t2 = _round_up(-(-r_total // nb), 8)
            if (-(-r_total // t2)) % num_cores == 0:
                tile_r = t2
                num_blocks = -(-r_total // t2)
            else:
                num_cores = 1

        bpc = num_blocks // num_cores          # row-blocks per core (exact)
        rem_rows = r_total % tile_r            # valid rows in last block (0 => full)
        acc_split = next(s for s in (8, 4, 2, 1) if tile_r % (8 * s) == 0)

        kernel = _make_bce_kernel(num_blocks, bpc, tile_r, rem_rows, acc_split)

        def in_index_map(c, j):
            return (c * bpc + j, 0)

        partials = pl.pallas_call(
            kernel,
            out_shape=jax.ShapeDtypeStruct((num_cores, 8, LANES), jnp.float32),
            grid_spec=pltpu.PrefetchScalarGridSpec(
                num_scalar_prefetch=0,
                grid=(num_cores, bpc),
                in_specs=[
                    pl.BlockSpec((tile_r, LANES), in_index_map),
                    pl.BlockSpec((tile_r, LANES), in_index_map),
                ],
                out_specs=pl.BlockSpec((1, 8, LANES), lambda c, j: (c, 0, 0)),
                scratch_shapes=[pltpu.VMEM((8, LANES), jnp.float32)],
            ),
            compiler_params=pltpu.CompilerParams(
                dimension_semantics=("parallel", "arbitrary"),
                vmem_limit_bytes=vmem_limit,
            ),
        )(p2, y2)
        total = total + jnp.sum(partials)

    if n_aligned != n:
        # <128-element ragged tail handled in plain JAX (avoids materializing a
        # full padded copy of both inputs just to lane-align them).
        pt = p[n_aligned:].astype(jnp.float32)
        yt = y[n_aligned:].astype(jnp.float32)
        lp = jnp.maximum(jnp.log(pt), -100.0)
        l1 = jnp.maximum(jnp.log(1.0 - pt), -100.0)
        total = total + jnp.sum(l1 + yt * (lp - l1))

    # Tiny scalar glue: negate + mean + focal transform.
    bce = -total / jnp.float32(n)
    bce_exp = jnp.exp(-bce)
    return alpha * (1.0 - bce_exp) ** gamma * bce


if __name__ == "__main__":
    key = jax.random.PRNGKey(0)
    k1, k2 = jax.random.split(key)

    # Small NCHW inputs consistent with a segmentation-style use case.
    x_shape = (2, 4, 16, 16)
    predicted = jax.nn.sigmoid(jax.random.normal(k1, x_shape, dtype=jnp.float32))
    label = (jax.random.uniform(k2, x_shape) > 0.5).astype(jnp.float32)

    loss_fn = jax.jit(focal_loss)
    out = loss_fn(predicted, label)
    out = jax.block_until_ready(out)

    # Pure-JAX reference check.
    p = predicted.reshape(-1)
    y = label.reshape(-1)
    bce_ref = jnp.mean(
        -(y * jnp.maximum(jnp.log(p), -100.0)
          + (1.0 - y) * jnp.maximum(jnp.log(1.0 - p), -100.0))
    )
    ref = ALPHA * (1.0 - jnp.exp(-bce_ref)) ** GAMMA * bce_ref
    assert jnp.allclose(out, ref, rtol=1e-5, atol=1e-6), (out, ref)

    print("KERNEL_OK")
</pallas_src>

<mosaic_0001>
module attributes {stable_mosaic.version = 11 : i64} {
  func.func @kernel(%arg0: i32, %arg1: i32, %arg2: memref<16x128xf32, #tpu.memory_space<vmem>>, %arg3: memref<16x128xf32, #tpu.memory_space<vmem>>, %arg4: memref<1x8x128xf32, #tpu.memory_space<vmem>>, %arg5: memref<8x128xf32, #tpu.memory_space<vmem>>) attributes {dimension_semantics = [#tpu.dimension_semantics<parallel>, #tpu.dimension_semantics<arbitrary>], iteration_bounds = array<i64: 1, 1>, scalar_prefetch = 0 : i64, scratch_operands = 1 : i64, tpu.core_type = #tpu.core_type<tc>, window_params = [{transform_indices = @transform_0, window_bounds = array<i64: 16, 128>}, {transform_indices = @transform_1, window_bounds = array<i64: 16, 128>}, {transform_indices = @transform_2, window_bounds = array<i64: 1, 8, 128>}]} {
    %c0_i32 = arith.constant 0 : i32
    %0 = arith.cmpi eq, %arg1, %c0_i32 : i32
    %1 = arith.extui %0 : i1 to i32
    %c0_i32_0 = arith.constant 0 : i32
    %2 = arith.cmpi ne, %1, %c0_i32_0 : i32
    scf.if %2 {
      %cst_14 = arith.constant 0.000000e+00 : f32
      %26 = vector.broadcast %cst_14 : f32 to vector<8x128xf32>
      %c0_15 = arith.constant 0 : index
      %c0_16 = arith.constant 0 : index
      %27 = vector.load %arg5[%c0_15, %c0_16] : memref<8x128xf32, #tpu.memory_space<vmem>>, vector<8x128xf32>
      tpu.vector_store %arg5[%c0_15, %c0_16], %26 {strides = array<i32>} : memref<8x128xf32, #tpu.memory_space<vmem>>, vector<8x128xf32>,
    } else {
    }
    %c0 = arith.constant 0 : index
    %c0_1 = arith.constant 0 : index
    %3 = vector.load %arg2[%c0, %c0_1] : memref<16x128xf32, #tpu.memory_space<vmem>>, vector<16x128xf32>
    %c0_2 = arith.constant 0 : index
    %c0_3 = arith.constant 0 : index
    %4 = vector.load %arg3[%c0_2, %c0_3] : memref<16x128xf32, #tpu.memory_space<vmem>>, vector<16x128xf32>
    %5 = math.log %3 : vector<16x128xf32>
    %cst = arith.constant -1.000000e+02 : f32
    %6 = vector.broadcast %cst : f32 to vector<16x128xf32>
    %7 = arith.maximumf %5, %6 : vector<16x128xf32>
    %cst_4 = arith.constant 1.000000e+00 : f32
    %8 = vector.broadcast %cst_4 : f32 to vector<16x128xf32>
    %9 = arith.subf %8, %3 : vector<16x128xf32>
    %10 = math.log %9 : vector<16x128xf32>
    %cst_5 = arith.constant -1.000000e+02 : f32
    %11 = vector.broadcast %cst_5 : f32 to vector<16x128xf32>
    %12 = arith.maximumf %10, %11 : vector<16x128xf32>
    %13 = arith.subf %7, %12 : vector<16x128xf32>
    %14 = arith.mulf %4, %13 : vector<16x128xf32>
    %15 = arith.addf %12, %14 : vector<16x128xf32>
    %16 = vector.shape_cast %15 : vector<16x128xf32> to vector<1x16x128xf32>
    %cst_6 = arith.constant dense<0.000000e+00> : vector<16x128xf32>
    %17 = vector.multi_reduction <add>, %16, %cst_6 [0] : vector<1x16x128xf32> to vector<16x128xf32>
    %18 = vector.shape_cast %17 : vector<16x128xf32> to vector<2x8x128xf32>
    %cst_7 = arith.constant dense<0.000000e+00> : vector<8x128xf32>
    %19 = vector.multi_reduction <add>, %18, %cst_7 [0] : vector<2x8x128xf32> to vector<8x128xf32>
    %c0_8 = arith.constant 0 : index
    %c0_9 = arith.constant 0 : index
    %20 = vector.load %arg5[%c0_8, %c0_9] : memref<8x128xf32, #tpu.memory_space<vmem>>, vector<8x128xf32>
    %21 = arith.addf %20, %19 : vector<8x128xf32>
    %c0_10 = arith.constant 0 : index
    %c0_11 = arith.constant 0 : index
    %22 = vector.load %arg5[%c0_10, %c0_11] : memref<8x128xf32, #tpu.memory_space<vmem>>, vector<8x128xf32>
    tpu.vector_store %arg5[%c0_10, %c0_11], %21 {strides = array<i32>} : memref<8x128xf32, #tpu.memory_space<vmem>>, vector<8x128xf32>,
    %c0_i32_12 = arith.constant 0 : i32
    %23 = arith.cmpi eq, %arg1, %c0_i32_12 : i32
    %24 = arith.extui %23 : i1 to i32
    %c0_i32_13 = arith.constant 0 : i32
    %25 = arith.cmpi ne, %24, %c0_i32_13 : i32
    scf.if %25 {
      %c0_14 = arith.constant 0 : index
      %c0_15 = arith.constant 0 : index
      %26 = vector.load %arg5[%c0_14, %c0_15] : memref<8x128xf32, #tpu.memory_space<vmem>>, vector<8x128xf32>
      %27 = vector.shape_cast %26 : vector<8x128xf32> to vector<1x8x128xf32>
      %c0_16 = arith.constant 0 : index
      %c0_17 = arith.constant 0 : index
      %c0_18 = arith.constant 0 : index
      %28 = vector.load %arg4[%c0_16, %c0_17, %c0_18] : memref<1x8x128xf32, #tpu.memory_space<vmem>>, vector<1x8x128xf32>
      tpu.vector_store %arg4[%c0_16, %c0_17, %c0_18], %27 {strides = array<i32>} : memref<1x8x128xf32, #tpu.memory_space<vmem>>, vector<1x8x128xf32>,
    } else {
    }
    return
  }
  func.func @transform_0(%arg0: i32, %arg1: i32) -> (i32, i32) {
    %c1_i32 = arith.constant 1 : i32
    %0 = arith.muli %arg0, %c1_i32 : i32
    %1 = arith.addi %0, %arg1 : i32
    %c0_i32 = arith.constant 0 : i32
    %c0_i32_0 = arith.constant 0 : i32
    return %1, %c0_i32 : i32, i32
  }
  func.func @transform_1(%arg0: i32, %arg1: i32) -> (i32, i32) {
    %c1_i32 = arith.constant 1 : i32
    %0 = arith.muli %arg0, %c1_i32 : i32
    %1 = arith.addi %0, %arg1 : i32
    %c0_i32 = arith.constant 0 : i32
    %c0_i32_0 = arith.constant 0 : i32
    return %1, %c0_i32 : i32, i32
  }
  func.func @transform_2(%arg0: i32, %arg1: i32) -> (i32, i32, i32) {
    %c0_i32 = arith.constant 0 : i32
    %c0_i32_0 = arith.constant 0 : i32
    %c0_i32_1 = arith.constant 0 : i32
    return %arg0, %c0_i32, %c0_i32_0 : i32, i32, i32
  }
}

</mosaic_0001>

<bundles_post_ra>
// kernel: focal_loss.1
= control target key start
LH: loop header
LB: loop body
LE: loop exit
PB: predicated region body
PF: predicated region fallthrough
CT: control target
= control target key end

     0   :  { %s149_s0 = inlined_call_operand.vmem [shape: f32[16,128], index: 0, kind: input, shape index: {}]   ;;  %s150_s1 = inlined_call_operand.vmem [shape: f32[16,128], index: 1, kind: input, shape index: {}]   ;;  %s151_s2 = inlined_call_operand.vmem [shape: f32[1,8,128], index: 2, kind: output, shape index: {}]  }
   0x1   :  { %v60_v0 = vld [vmem:[%s149_s0] sm:$0xff]  ;;  %v61_v1 = vld [vmem:[%s149_s0 + $0x8] sm:$0xff] }
   0x2   :  { %111 = vlog2.f32 %v60_v0  ;;  %v70_v2 = vsub.f32 1.0, %v60_v0  ;;  %v71_v3 = vsub.f32 1.0, %v61_v1  ;;  %v62_v15 = vld [vmem:[%s150_s1] sm:$0xff]  ;;  %v63_v17 = vld [vmem:[%s150_s1 + $0x8] sm:$0xff] }
   0x3   :  { %113 = vlog2.f32 %v61_v1 }
   0x4   :  { %115 = vlog2.f32 %v70_v2 }
   0x5   :  { %117 = vlog2.f32 %v71_v3 }
   0xf   :  { %v112_v4 = vpop.eup %111 }
  0x10   :  { %v114_v5 = vpop.eup %113  ;;  %v65_v6 = vmul.f32 0.6931472, %v112_v4 }
  0x11   :  { %v116_v7 = vpop.eup %115  ;;  %v67_v8 = vmul.f32 0.6931472, %v114_v5 }
  0x12   :  { %v118_v9 = vpop.eup %117  ;;  %v68_v10 = vmax.f32 %v65_v6, -100.0  ;;  %v73_v11 = vmul.f32 0.6931472, %v116_v7 }
  0x13   :  { %v69_v12 = vmax.f32 %v67_v8, -100.0  ;;  %v75_v13 = vmul.f32 0.6931472, %v118_v9 }
  0x14   :  { %v76_v14 = vmax.f32 %v73_v11, -100.0 }
  0x15   :  { %v77_v16 = vmax.f32 %v75_v13, -100.0 }
  0x16   :  { %v78_v18 = vsub.f32 %v68_v10, %v76_v14 }
  0x17   :  { %v79_v19 = vsub.f32 %v69_v12, %v77_v16 }
  0x18   :  { %v80_v20 = vmul.f32 %v78_v18, %v62_v15 }
  0x19   :  { %v81_v21 = vmul.f32 %v79_v19, %v63_v17 }
  0x1a   :  { %v82_v22 = vadd.f32 %v80_v20, %v76_v14 }
  0x1b   :  { %v83_v23 = vadd.f32 %v81_v21, %v77_v16 }
  0x1d   :  { %v86_v24 = vadd.f32 %v83_v23, %v82_v22 }
  0x1f   :  { %94 = vst [vmem:[%s151_s2] sm:$0xff] %v86_v24 }

</bundles_post_ra>
